<compile_context>
chip_gen: v7x
topology: tpu7x:2x2x1
jax: 0.10.0
libtpu: 0.0.40
codegen_flags: <defaults>
</compile_context>

<pallas_src>
import jax
import jax.numpy as jnp
from jax import lax
from jax.experimental import pallas as pl
from jax.experimental.pallas import tpu as pltpu

DH = 50            # logical hidden size (PyTorch dh)
DHP = 128          # hidden size zero-padded to a full lane tile
DW = 300           # embedding dim
DW_LANES = 384     # 300 pads to 3 lane tiles in VMEM (footprint accounting)
VOCAB = 7612 + 1   # words_length + 1
NCLS = 4


def _round_up(x, m):
    return ((x + m - 1) // m) * m


def _num_tensorcores():
    """Best-effort detection of dual-TensorCore chips (v4 / v5p / v7x)."""
    try:
        kind = jax.devices()[0].device_kind.lower()
    except Exception:
        return 1
    return 2 if any(t in kind for t in ("v4", "v5p", "7x", "v7")) else 1


def _vmem_capacity_bytes():
    try:
        info = pltpu.get_tpu_info()
        return int(getattr(info, "vmem_capacity_bytes"))
    except Exception:
        return 64 * 2**20          # conservative default (v7x per-TC size)


def _pick_batch_tile(b, prefer_split):
    cands = [t for t in (256, 128, 64, 32, 16, 8) if t <= b and b % t == 0]
    if not cands:
        return b                   # tiny batch: one tile covering all of B
    if prefer_split:
        for t in cands:            # largest tile that still yields >=2 tiles
            if b // t >= 2:
                return t
    return cands[0]


def _make_rnn_kernel(tb, tc, tail_valid, unroll):
    """Fused kernel: per-chunk input projection (one big MXU matmul, written
    time-major) + bounded-unroll sequential tanh recurrence; linear head +
    exact softmax on the last chunk."""

    def run_steps(h_scr, z_scr, whh, n_steps):
        def body(s, h):
            # z_scr[s] is a dense (tb, DHP) tile (time-major layout).
            pre = z_scr[s] + jnp.dot(h.astype(jnp.bfloat16), whh,
                                     preferred_element_type=jnp.float32)
            return jnp.tanh(pre)
        h_scr[...] = lax.fori_loop(0, n_steps, body, h_scr[...],
                                   unroll=min(unroll, n_steps))

    def kernel(x_ref, wih_ref, whh_ref, b_ref, wl_ref, bl_ref, out_ref,
               h_scr, z_scr):
        c = pl.program_id(1)                       # time-chunk index (sequential)
        n_last = pl.num_programs(1) - 1

        @pl.when(c == 0)
        def _init():
            # h defaults to None in the PyTorch forward -> zero initial state
            h_scr[...] = jnp.zeros_like(h_scr)

        # (1) Input projection for the whole chunk as ONE MXU matmul
        #     (bf16 operands, f32 accumulation; b_ref = b_ih + b_hh folded),
        #     stored TIME-MAJOR so each serial step reads a dense tile.
        x = x_ref[...].reshape(tc * tb, DW)
        z = jnp.dot(x, wih_ref[...], preferred_element_type=jnp.float32) + b_ref[...]
        z_scr[...] = z.reshape(tc, tb, DHP)

        whh = whh_ref[...]                         # (DHP, DHP) bf16, hoisted once
        # TODO(synk): verify from the bundle dump that Mosaic keeps this 128x128
        # RHS stationary across the unrolled steps; if not, drive the MXU
        # explicitly with pltpu.matmul_push_rhs / matmul_acc_lhs / matmul_pop.

        # (2) Sequential recurrence.  No per-step masking: full chunks run tc
        #     steps; only the tail chunk runs its (static) shorter loop.
        if tail_valid == tc:
            run_steps(h_scr, z_scr, whh, tc)
        else:
            @pl.when(c < n_last)
            def _full_chunk():
                run_steps(h_scr, z_scr, whh, tc)

            @pl.when(c == n_last)
            def _tail_chunk():
                run_steps(h_scr, z_scr, whh, tail_valid)

        # (3) Last chunk: linear head + exact softmax, written once per tile.
        @pl.when(c == n_last)
        def _finalize():
            h = h_scr[...]
            logits = jnp.dot(h, wl_ref[...],
                             preferred_element_type=jnp.float32) + bl_ref[...]
            m = jnp.max(logits, axis=-1, keepdims=True)
            e = jnp.exp(logits - m)
            out_ref[...] = e / jnp.sum(e, axis=-1, keepdims=True)

    return kernel


def rnn_forward(tokens, params, *, time_chunk=None, batch_tile=None, unroll=8):
    """tokens: (B, T) int32 token ids. Returns (B, 4) softmax probabilities."""
    B, T = tokens.shape
    assert T >= 1, "need at least one timestep"

    # ---- tile selection -------------------------------------------------
    tc = time_chunk if time_chunk is not None else min(32, T)
    tb = (batch_tile if batch_tile is not None
          else _pick_batch_tile(B, _num_tensorcores() >= 2))
    assert B % tb == 0

    vmem_cap = _vmem_capacity_bytes()
    vmem_limit = max(32 * 2**20, min(int(vmem_cap * 0.70), 100 * 2**20))
    budget = int(vmem_limit * 0.60)   # headroom for compiler-internal scratch

    def footprint(tb_, tc_):
        x_blk = tb_ * tc_ * DW_LANES * 2        # bf16 x chunk (lane-padded)
        z_buf = tb_ * tc_ * DHP * 4             # f32 time-major pre-activations
        small = 3 * tb_ * DHP * 4               # h_scr + double-buffered out
        fixed = 1 * 2**20                       # double-buffered weights/biases
        return 2 * x_blk + z_buf + small + fixed

    if time_chunk is None and batch_tile is None:
        while footprint(tb, tc) > budget:
            if tc > 8:
                tc = max(8, tc // 2)            # halve tc before tb
            elif tb > 8 and B % (tb // 2) == 0:
                tb //= 2
            else:
                break

    t_pad = _round_up(T, tc)
    n_chunks = t_pad // tc
    tail_valid = T - (n_chunks - 1) * tc        # in (0, tc]
    n_btiles = B // tb

    # ---- embedding gather (data-dependent) stays in plain JAX ------------
    # Tokens are transposed BEFORE the gather, so the embedded sequence is
    # produced directly in time-major (T, B, DW) layout (no big transpose).
    xe = jnp.take(params["emb"], tokens.T, axis=0)          # (T, B, DW) bf16
    if t_pad != T:
        xe = jnp.pad(xe, ((0, t_pad - T), (0, 0), (0, 0)))

    kernel = _make_rnn_kernel(tb, tc, tail_valid, unroll)
    # TODO(synk): T / tail_valid are baked in statically (recompile per distinct
    # sequence length); a SMEM scalar-prefetched length would avoid that.

    return pl.pallas_call(
        kernel,
        out_shape=jax.ShapeDtypeStruct((B, NCLS), jnp.float32),
        grid=(n_btiles, n_chunks),
        in_specs=[
            pl.BlockSpec((tc, tb, DW), lambda bt, ct: (ct, bt, 0)),   # x chunk (time-major)
            pl.BlockSpec((DW, DHP), lambda bt, ct: (0, 0)),           # W_ih^T (padded, bf16)
            pl.BlockSpec((DHP, DHP), lambda bt, ct: (0, 0)),          # W_hh^T (padded, bf16)
            pl.BlockSpec((1, DHP), lambda bt, ct: (0, 0)),            # b_ih + b_hh (folded)
            pl.BlockSpec((DHP, NCLS), lambda bt, ct: (0, 0)),         # W_lin^T (padded)
            pl.BlockSpec((1, NCLS), lambda bt, ct: (0, 0)),           # b_lin
        ],
        out_specs=pl.BlockSpec((tb, NCLS), lambda bt, ct: (bt, 0)),
        scratch_shapes=[
            pltpu.VMEM((tb, DHP), jnp.float32),      # hidden-state carry
            pltpu.VMEM((tc, tb, DHP), jnp.float32),  # time-major pre-activations
        ],
        compiler_params=pltpu.CompilerParams(
            # batch tiles are independent -> megacore-parallel on dual-TC chips;
            # time chunks carry the recurrence -> sequential.
            dimension_semantics=("parallel", "arbitrary"),
            vmem_limit_bytes=vmem_limit),
    )(xe, params["w_ih_t"], params["w_hh_t"], params["b_comb"],
      params["w_lin_t"], params["b_lin"])


def init_params(key):
    """Parameters mirroring the PyTorch module's shapes, prepared for the kernel:
    weights pre-transposed, DH zero-padded 50->128 (padded lanes provably stay
    exactly 0 through the recurrence), b_ih+b_hh folded, MXU operands in bf16
    (f32 accumulation in-kernel -- documented deviation from f32 PyTorch)."""
    k_emb, k_wih, k_whh, k_bih, k_bhh, k_wl, k_bl = jax.random.split(key, 7)
    s = 1.0 / jnp.sqrt(DH)
    emb = jax.random.normal(k_emb, (VOCAB, DW), jnp.float32)
    w_ih = jax.random.uniform(k_wih, (DW, DH), jnp.float32, -s, s)
    w_hh = jax.random.uniform(k_whh, (DH, DH), jnp.float32, -s, s)
    b_ih = jax.random.uniform(k_bih, (DH,), jnp.float32, -s, s)
    b_hh = jax.random.uniform(k_bhh, (DH,), jnp.float32, -s, s)
    w_l = jax.random.uniform(k_wl, (DH, NCLS), jnp.float32, -s, s)
    b_l = jax.random.uniform(k_bl, (NCLS,), jnp.float32, -s, s)
    pad = DHP - DH
    return {
        "emb":     emb.astype(jnp.bfloat16),
        "w_ih_t":  jnp.pad(w_ih, ((0, 0), (0, pad))).astype(jnp.bfloat16),
        "w_hh_t":  jnp.pad(w_hh, ((0, pad), (0, pad))).astype(jnp.bfloat16),
        "b_comb":  jnp.pad(b_ih + b_hh, (0, pad)).reshape(1, DHP),
        "w_lin_t": jnp.pad(w_l, ((0, pad), (0, 0))),
        "b_lin":   b_l.reshape(1, NCLS),
    }


def reference_forward(tokens, params):
    """Pure-JAX reference with the kernel's numerics (bf16 operands, f32 accum)."""
    B, T = tokens.shape
    xe = jnp.take(params["emb"], tokens, axis=0)                      # (B,T,DW) bf16
    z = (jnp.dot(xe.reshape(B * T, DW), params["w_ih_t"],
                 preferred_element_type=jnp.float32)
         + params["b_comb"]).reshape(B, T, DHP)

    def step(h, z_t):
        pre = z_t + jnp.dot(h.astype(jnp.bfloat16), params["w_hh_t"],
                            preferred_element_type=jnp.float32)
        return jnp.tanh(pre), None

    h0 = jnp.zeros((B, DHP), jnp.float32)
    h, _ = lax.scan(step, h0, jnp.swapaxes(z, 0, 1))
    logits = jnp.dot(h, params["w_lin_t"],
                     preferred_element_type=jnp.float32) + params["b_lin"]
    return jax.nn.softmax(logits, axis=-1)


if __name__ == "__main__":
    root = jax.random.PRNGKey(0)
    k_params, k_tok = jax.random.split(root)
    params = init_params(k_params)

    # Case 1: small shape consistent with the module (batch=2, seq=8).
    B, T = 2, 8
    tokens = jax.random.randint(k_tok, (B, T), 0, VOCAB, dtype=jnp.int32)
    out = jax.block_until_ready(jax.jit(rnn_forward)(tokens, params))
    ref = jax.block_until_ready(reference_forward(tokens, params))
    assert out.shape == (B, NCLS)
    assert bool(jnp.all(jnp.isfinite(out)))
    assert float(jnp.max(jnp.abs(jnp.sum(out, axis=-1) - 1.0))) < 1e-5   # exact softmax
    assert float(jnp.max(jnp.abs(out - ref))) < 2e-3

    # Case 2: exercises multi-chunk time axis + shortened tail chunk (T=37, tc=16).
    B2, T2 = 4, 37
    tokens2 = jax.random.randint(jax.random.PRNGKey(1), (B2, T2), 0, VOCAB,
                                 dtype=jnp.int32)
    fwd2 = jax.jit(lambda t, p: rnn_forward(t, p, time_chunk=16))
    out2 = jax.block_until_ready(fwd2(tokens2, params))
    ref2 = jax.block_until_ready(reference_forward(tokens2, params))
    assert float(jnp.max(jnp.abs(out2 - ref2))) < 2e-3

    print("KERNEL_OK")
</pallas_src>

<mosaic_0001>
module attributes {stable_mosaic.version = 11 : i64} {
  func.func @kernel(%arg0: i32, %arg1: i32, %arg2: memref<8x2x300xbf16, #tpu.memory_space<vmem>>, %arg3: memref<300x128xbf16, #tpu.memory_space<vmem>>, %arg4: memref<128x128xbf16, #tpu.memory_space<vmem>>, %arg5: memref<1x128xf32, #tpu.memory_space<vmem>>, %arg6: memref<128x4xf32, #tpu.memory_space<vmem>>, %arg7: memref<1x4xf32, #tpu.memory_space<vmem>>, %arg8: memref<2x4xf32, #tpu.memory_space<vmem>>, %arg9: memref<2x128xf32, #tpu.memory_space<vmem>>, %arg10: memref<8x2x128xf32, #tpu.memory_space<vmem>>) attributes {dimension_semantics = [#tpu.dimension_semantics<parallel>, #tpu.dimension_semantics<arbitrary>], iteration_bounds = array<i64: 1, 1>, scalar_prefetch = 0 : i64, scratch_operands = 2 : i64, tpu.core_type = #tpu.core_type<tc>, window_params = [{transform_indices = @transform_0, window_bounds = array<i64: 8, 2, 300>}, {pipeline_mode = #tpu.pipeline_mode<synchronous>, transform_indices = @transform_1, window_bounds = array<i64: 300, 128>}, {pipeline_mode = #tpu.pipeline_mode<synchronous>, transform_indices = @transform_2, window_bounds = array<i64: 128, 128>}, {pipeline_mode = #tpu.pipeline_mode<synchronous>, transform_indices = @transform_3, window_bounds = array<i64: 1, 128>}, {pipeline_mode = #tpu.pipeline_mode<synchronous>, transform_indices = @transform_4, window_bounds = array<i64: 128, 4>}, {pipeline_mode = #tpu.pipeline_mode<synchronous>, transform_indices = @transform_5, window_bounds = array<i64: 1, 4>}, {transform_indices = @transform_6, window_bounds = array<i64: 2, 4>}]} {
    %c0_i32 = arith.constant 0 : i32
    %0 = arith.cmpi eq, %arg1, %c0_i32 : i32
    %1 = arith.extui %0 : i1 to i32
    %c0_i32_0 = arith.constant 0 : i32
    %2 = arith.cmpi ne, %1, %c0_i32_0 : i32
    scf.if %2 {
      %cst_43 = arith.constant 0.000000e+00 : f32
      %74 = vector.broadcast %cst_43 : f32 to vector<2x128xf32>
      %c0_44 = arith.constant 0 : index
      %c0_45 = arith.constant 0 : index
      %75 = vector.load %arg9[%c0_44, %c0_45] : memref<2x128xf32, #tpu.memory_space<vmem>>, vector<2x128xf32>
      tpu.vector_store %arg9[%c0_44, %c0_45], %74 {strides = array<i32>} : memref<2x128xf32, #tpu.memory_space<vmem>>, vector<2x128xf32>,
    } else {
    }
    %c0 = arith.constant 0 : index
    %c0_1 = arith.constant 0 : index
    %c0_2 = arith.constant 0 : index
    %3 = vector.load %arg2[%c0, %c0_1, %c0_2] : memref<8x2x300xbf16, #tpu.memory_space<vmem>>, vector<8x2x300xbf16>
    %4 = vector.shape_cast %3 : vector<8x2x300xbf16> to vector<16x300xbf16>
    %c0_3 = arith.constant 0 : index
    %c0_4 = arith.constant 0 : index
    %5 = vector.load %arg3[%c0_3, %c0_4] : memref<300x128xbf16, #tpu.memory_space<vmem>>, vector<300x128xbf16>
    %cst = arith.constant dense<0.000000e+00> : vector<16x128xf32>
    %6 = tpu.matmul %4, %5, %cst {dimension_numbers = #tpu.dot_dimension_numbers<[1], [0], [0], [1], [0, 0, 1, 1], [], []>} : vector<16x300xbf16>, vector<300x128xbf16>, vector<16x128xf32> -> vector<16x128xf32>
    %c0_5 = arith.constant 0 : index
    %c0_6 = arith.constant 0 : index
    %7 = vector.load %arg5[%c0_5, %c0_6] : memref<1x128xf32, #tpu.memory_space<vmem>>, vector<1x128xf32>
    %8 = vector.broadcast %7 : vector<1x128xf32> to vector<16x128xf32>
    %9 = arith.addf %6, %8 : vector<16x128xf32>
    %10 = vector.shape_cast %9 : vector<16x128xf32> to vector<8x2x128xf32>
    %c0_7 = arith.constant 0 : index
    %c0_8 = arith.constant 0 : index
    %c0_9 = arith.constant 0 : index
    %11 = vector.load %arg10[%c0_7, %c0_8, %c0_9] : memref<8x2x128xf32, #tpu.memory_space<vmem>>, vector<8x2x128xf32>
    tpu.vector_store %arg10[%c0_7, %c0_8, %c0_9], %10 {strides = array<i32>} : memref<8x2x128xf32, #tpu.memory_space<vmem>>, vector<8x2x128xf32>,
    %c0_10 = arith.constant 0 : index
    %c0_11 = arith.constant 0 : index
    %12 = vector.load %arg4[%c0_10, %c0_11] : memref<128x128xbf16, #tpu.memory_space<vmem>>, vector<128x128xbf16>
    %c0_12 = arith.constant 0 : index
    %c0_13 = arith.constant 0 : index
    %13 = vector.load %arg9[%c0_12, %c0_13] : memref<2x128xf32, #tpu.memory_space<vmem>>, vector<2x128xf32>
    %c0_i32_14 = arith.constant 0 : i32
    %14 = arith.index_cast %c0_i32_14 : i32 to index
    %c0_15 = arith.constant 0 : index
    %c0_16 = arith.constant 0 : index
    %15 = vector.load %arg10[%14, %c0_15, %c0_16] : memref<8x2x128xf32, #tpu.memory_space<vmem>>, vector<1x2x128xf32>
    %16 = vector.shape_cast %15 : vector<1x2x128xf32> to vector<2x128xf32>
    %17 = arith.truncf %13 : vector<2x128xf32> to vector<2x128xbf16>
    %cst_17 = arith.constant dense<0.000000e+00> : vector<2x128xf32>
    %18 = tpu.matmul %17, %12, %cst_17 {dimension_numbers = #tpu.dot_dimension_numbers<[1], [0], [0], [1], [0, 0, 1, 1], [], []>} : vector<2x128xbf16>, vector<128x128xbf16>, vector<2x128xf32> -> vector<2x128xf32>
    %19 = arith.addf %16, %18 : vector<2x128xf32>
    %20 = math.tanh %19 : vector<2x128xf32>
    %c1_i32 = arith.constant 1 : i32
    %21 = arith.index_cast %c1_i32 : i32 to index
    %c0_18 = arith.constant 0 : index
    %c0_19 = arith.constant 0 : index
    %22 = vector.load %arg10[%21, %c0_18, %c0_19] : memref<8x2x128xf32, #tpu.memory_space<vmem>>, vector<1x2x128xf32>
    %23 = vector.shape_cast %22 : vector<1x2x128xf32> to vector<2x128xf32>
    %24 = arith.truncf %20 : vector<2x128xf32> to vector<2x128xbf16>
    %cst_20 = arith.constant dense<0.000000e+00> : vector<2x128xf32>
    %25 = tpu.matmul %24, %12, %cst_20 {dimension_numbers = #tpu.dot_dimension_numbers<[1], [0], [0], [1], [0, 0, 1, 1], [], []>} : vector<2x128xbf16>, vector<128x128xbf16>, vector<2x128xf32> -> vector<2x128xf32>
    %26 = arith.addf %23, %25 : vector<2x128xf32>
    %27 = math.tanh %26 : vector<2x128xf32>
    %c2_i32 = arith.constant 2 : i32
    %28 = arith.index_cast %c2_i32 : i32 to index
    %c0_21 = arith.constant 0 : index
    %c0_22 = arith.constant 0 : index
    %29 = vector.load %arg10[%28, %c0_21, %c0_22] : memref<8x2x128xf32, #tpu.memory_space<vmem>>, vector<1x2x128xf32>
    %30 = vector.shape_cast %29 : vector<1x2x128xf32> to vector<2x128xf32>
    %31 = arith.truncf %27 : vector<2x128xf32> to vector<2x128xbf16>
    %cst_23 = arith.constant dense<0.000000e+00> : vector<2x128xf32>
    %32 = tpu.matmul %31, %12, %cst_23 {dimension_numbers = #tpu.dot_dimension_numbers<[1], [0], [0], [1], [0, 0, 1, 1], [], []>} : vector<2x128xbf16>, vector<128x128xbf16>, vector<2x128xf32> -> vector<2x128xf32>
    %33 = arith.addf %30, %32 : vector<2x128xf32>
    %34 = math.tanh %33 : vector<2x128xf32>
    %c3_i32 = arith.constant 3 : i32
    %35 = arith.index_cast %c3_i32 : i32 to index
    %c0_24 = arith.constant 0 : index
    %c0_25 = arith.constant 0 : index
    %36 = vector.load %arg10[%35, %c0_24, %c0_25] : memref<8x2x128xf32, #tpu.memory_space<vmem>>, vector<1x2x128xf32>
    %37 = vector.shape_cast %36 : vector<1x2x128xf32> to vector<2x128xf32>
    %38 = arith.truncf %34 : vector<2x128xf32> to vector<2x128xbf16>
    %cst_26 = arith.constant dense<0.000000e+00> : vector<2x128xf32>
    %39 = tpu.matmul %38, %12, %cst_26 {dimension_numbers = #tpu.dot_dimension_numbers<[1], [0], [0], [1], [0, 0, 1, 1], [], []>} : vector<2x128xbf16>, vector<128x128xbf16>, vector<2x128xf32> -> vector<2x128xf32>
    %40 = arith.addf %37, %39 : vector<2x128xf32>
    %41 = math.tanh %40 : vector<2x128xf32>
    %c4_i32 = arith.constant 4 : i32
    %42 = arith.index_cast %c4_i32 : i32 to index
    %c0_27 = arith.constant 0 : index
    %c0_28 = arith.constant 0 : index
    %43 = vector.load %arg10[%42, %c0_27, %c0_28] : memref<8x2x128xf32, #tpu.memory_space<vmem>>, vector<1x2x128xf32>
    %44 = vector.shape_cast %43 : vector<1x2x128xf32> to vector<2x128xf32>
    %45 = arith.truncf %41 : vector<2x128xf32> to vector<2x128xbf16>
    %cst_29 = arith.constant dense<0.000000e+00> : vector<2x128xf32>
    %46 = tpu.matmul %45, %12, %cst_29 {dimension_numbers = #tpu.dot_dimension_numbers<[1], [0], [0], [1], [0, 0, 1, 1], [], []>} : vector<2x128xbf16>, vector<128x128xbf16>, vector<2x128xf32> -> vector<2x128xf32>
    %47 = arith.addf %44, %46 : vector<2x128xf32>
    %48 = math.tanh %47 : vector<2x128xf32>
    %c5_i32 = arith.constant 5 : i32
    %49 = arith.index_cast %c5_i32 : i32 to index
    %c0_30 = arith.constant 0 : index
    %c0_31 = arith.constant 0 : index
    %50 = vector.load %arg10[%49, %c0_30, %c0_31] : memref<8x2x128xf32, #tpu.memory_space<vmem>>, vector<1x2x128xf32>
    %51 = vector.shape_cast %50 : vector<1x2x128xf32> to vector<2x128xf32>
    %52 = arith.truncf %48 : vector<2x128xf32> to vector<2x128xbf16>
    %cst_32 = arith.constant dense<0.000000e+00> : vector<2x128xf32>
    %53 = tpu.matmul %52, %12, %cst_32 {dimension_numbers = #tpu.dot_dimension_numbers<[1], [0], [0], [1], [0, 0, 1, 1], [], []>} : vector<2x128xbf16>, vector<128x128xbf16>, vector<2x128xf32> -> vector<2x128xf32>
    %54 = arith.addf %51, %53 : vector<2x128xf32>
    %55 = math.tanh %54 : vector<2x128xf32>
    %c6_i32 = arith.constant 6 : i32
    %56 = arith.index_cast %c6_i32 : i32 to index
    %c0_33 = arith.constant 0 : index
    %c0_34 = arith.constant 0 : index
    %57 = vector.load %arg10[%56, %c0_33, %c0_34] : memref<8x2x128xf32, #tpu.memory_space<vmem>>, vector<1x2x128xf32>
    %58 = vector.shape_cast %57 : vector<1x2x128xf32> to vector<2x128xf32>
    %59 = arith.truncf %55 : vector<2x128xf32> to vector<2x128xbf16>
    %cst_35 = arith.constant dense<0.000000e+00> : vector<2x128xf32>
    %60 = tpu.matmul %59, %12, %cst_35 {dimension_numbers = #tpu.dot_dimension_numbers<[1], [0], [0], [1], [0, 0, 1, 1], [], []>} : vector<2x128xbf16>, vector<128x128xbf16>, vector<2x128xf32> -> vector<2x128xf32>
    %61 = arith.addf %58, %60 : vector<2x128xf32>
    %62 = math.tanh %61 : vector<2x128xf32>
    %c7_i32 = arith.constant 7 : i32
    %63 = arith.index_cast %c7_i32 : i32 to index
    %c0_36 = arith.constant 0 : index
    %c0_37 = arith.constant 0 : index
    %64 = vector.load %arg10[%63, %c0_36, %c0_37] : memref<8x2x128xf32, #tpu.memory_space<vmem>>, vector<1x2x128xf32>
    %65 = vector.shape_cast %64 : vector<1x2x128xf32> to vector<2x128xf32>
    %66 = arith.truncf %62 : vector<2x128xf32> to vector<2x128xbf16>
    %cst_38 = arith.constant dense<0.000000e+00> : vector<2x128xf32>
    %67 = tpu.matmul %66, %12, %cst_38 {dimension_numbers = #tpu.dot_dimension_numbers<[1], [0], [0], [1], [0, 0, 1, 1], [], []>} : vector<2x128xbf16>, vector<128x128xbf16>, vector<2x128xf32> -> vector<2x128xf32>
    %68 = arith.addf %65, %67 : vector<2x128xf32>
    %69 = math.tanh %68 : vector<2x128xf32>
    %c8_i32 = arith.constant 8 : i32
    %c0_39 = arith.constant 0 : index
    %c0_40 = arith.constant 0 : index
    %70 = vector.load %arg9[%c0_39, %c0_40] : memref<2x128xf32, #tpu.memory_space<vmem>>, vector<2x128xf32>
    tpu.vector_store %arg9[%c0_39, %c0_40], %69 {strides = array<i32>} : memref<2x128xf32, #tpu.memory_space<vmem>>, vector<2x128xf32>,
    %c0_i32_41 = arith.constant 0 : i32
    %71 = arith.cmpi eq, %arg1, %c0_i32_41 : i32
    %72 = arith.extui %71 : i1 to i32
    %c0_i32_42 = arith.constant 0 : i32
    %73 = arith.cmpi ne, %72, %c0_i32_42 : i32
    scf.if %73 {
      %c0_43 = arith.constant 0 : index
      %c0_44 = arith.constant 0 : index
      %74 = vector.load %arg9[%c0_43, %c0_44] : memref<2x128xf32, #tpu.memory_space<vmem>>, vector<2x128xf32>
      %c0_45 = arith.constant 0 : index
      %c0_46 = arith.constant 0 : index
      %75 = vector.load %arg6[%c0_45, %c0_46] : memref<128x4xf32, #tpu.memory_space<vmem>>, vector<128x4xf32>
      %cst_47 = arith.constant dense<0.000000e+00> : vector<2x4xf32>
      %76 = tpu.matmul %74, %75, %cst_47 {dimension_numbers = #tpu.dot_dimension_numbers<[1], [0], [0], [1], [0, 0, 1, 1], [], []>} : vector<2x128xf32>, vector<128x4xf32>, vector<2x4xf32> -> vector<2x4xf32>
      %c0_48 = arith.constant 0 : index
      %c0_49 = arith.constant 0 : index
      %77 = vector.load %arg7[%c0_48, %c0_49] : memref<1x4xf32, #tpu.memory_space<vmem>>, vector<1x4xf32>
      %78 = vector.broadcast %77 : vector<1x4xf32> to vector<2x4xf32>
      %79 = arith.addf %76, %78 : vector<2x4xf32>
      %cst_50 = arith.constant dense<0xFF800000> : vector<2xf32>
      %80 = vector.multi_reduction <maximumf>, %79, %cst_50 [1] : vector<2x4xf32> to vector<2xf32>
      %81 = vector.shape_cast %80 : vector<2xf32> to vector<2x1xf32>
      %82 = vector.broadcast %81 : vector<2x1xf32> to vector<2x4xf32>
      %83 = arith.subf %79, %82 : vector<2x4xf32>
      %84 = math.exp %83 : vector<2x4xf32>
      %cst_51 = arith.constant dense<0.000000e+00> : vector<2xf32>
      %85 = vector.multi_reduction <add>, %84, %cst_51 [1] : vector<2x4xf32> to vector<2xf32>
      %86 = vector.shape_cast %85 : vector<2xf32> to vector<2x1xf32>
      %87 = vector.broadcast %86 : vector<2x1xf32> to vector<2x4xf32>
      %88 = arith.divf %84, %87 : vector<2x4xf32>
      %c0_52 = arith.constant 0 : index
      %c0_53 = arith.constant 0 : index
      %89 = vector.load %arg8[%c0_52, %c0_53] : memref<2x4xf32, #tpu.memory_space<vmem>>, vector<2x4xf32>
      tpu.vector_store %arg8[%c0_52, %c0_53], %88 {strides = array<i32>} : memref<2x4xf32, #tpu.memory_space<vmem>>, vector<2x4xf32>,
    } else {
    }
    return
  }
  func.func @transform_0(%arg0: i32, %arg1: i32) -> (i32, i32, i32) {
    %c0_i32 = arith.constant 0 : i32
    %c0_i32_0 = arith.constant 0 : i32
    return %arg1, %arg0, %c0_i32 : i32, i32, i32
  }
  func.func @transform_1(%arg0: i32, %arg1: i32) -> (i32, i32) {
    %c0_i32 = arith.constant 0 : i32
    %c0_i32_0 = arith.constant 0 : i32
    %c0_i32_1 = arith.constant 0 : i32
    return %c0_i32, %c0_i32_0 : i32, i32
  }
  func.func @transform_2(%arg0: i32, %arg1: i32) -> (i32, i32) {
    %c0_i32 = arith.constant 0 : i32
    %c0_i32_0 = arith.constant 0 : i32
    %c0_i32_1 = arith.constant 0 : i32
    return %c0_i32, %c0_i32_0 : i32, i32
  }
  func.func @transform_3(%arg0: i32, %arg1: i32) -> (i32, i32) {
    %c0_i32 = arith.constant 0 : i32
    %c0_i32_0 = arith.constant 0 : i32
    %c0_i32_1 = arith.constant 0 : i32
    return %c0_i32, %c0_i32_0 : i32, i32
  }
  func.func @transform_4(%arg0: i32, %arg1: i32) -> (i32, i32) {
    %c0_i32 = arith.constant 0 : i32
    %c0_i32_0 = arith.constant 0 : i32
    %c0_i32_1 = arith.constant 0 : i32
    return %c0_i32, %c0_i32_0 : i32, i32
  }
  func.func @transform_5(%arg0: i32, %arg1: i32) -> (i32, i32) {
    %c0_i32 = arith.constant 0 : i32
    %c0_i32_0 = arith.constant 0 : i32
    %c0_i32_1 = arith.constant 0 : i32
    return %c0_i32, %c0_i32_0 : i32, i32
  }
  func.func @transform_6(%arg0: i32, %arg1: i32) -> (i32, i32) {
    %c0_i32 = arith.constant 0 : i32
    %c0_i32_0 = arith.constant 0 : i32
    return %arg0, %c0_i32 : i32, i32
  }
}

</mosaic_0001>

<bundles_post_ra>
// kernel: rnn_forward.1
= control target key start
LH: loop header
LB: loop body
LE: loop exit
PB: predicated region body
PF: predicated region fallthrough
CT: control target
= control target key end

     0   :  { %v1419_v1 = vmov 0.0   ;;  %vm1420_vm0 = vmmov 0   ;;  %vm277_vm1 = vcmask 1045504   ;;  %v98_v13 = vlaneseq  ;;  %s1806_s0 = inlined_call_operand.vmem [shape: bf16[8,2,300], index: 0, kind: input, shape index: {}]   ;;  %s1807_s1 = inlined_call_operand.vmem [shape: bf16[300,128], index: 1, kind: input, shape index: {}]   ;;  %s1808_s2 = inlined_call_operand.vmem [shape: bf16[128,128], index: 2, kind: input, shape index: {}]   ;;  %s1809_s3 = inlined_call_operand.vmem [shape: f32[1,128], index: 3, kind: input, shape index: {}]   ;;  %s1810_s4 = inlined_call_operand.vmem [shape: f32[128,4], index: 4, kind: input, shape index: {}]   ;;  %s1811_s5 = inlined_call_operand.vmem [shape: f32[1,4], index: 5, kind: input, shape index: {}]   ;;  %s1812_s6 = inlined_call_operand.hbm [shape: f32[2,4], index: 6, kind: output, shape index: {}]  }
   0x1   :  { %v1348_v0 = vld [vmem:[%s1807_s1 + $0x40] sm:$0xff]   ;;  %1113 = vmatprep.subr.bf16.mxu1 %v1419_v1  ;;  %29 = vst [vmem:[#allocation2] sm:$0x3] %v1419_v1  ;;  %v1351_v4 = vld [vmem:[%s1807_s1 + $0x48] sm:$0xff]   ;;  %1119 = vmatprep.mubr.msk.bf16.mxu1 %vm1420_vm0, %v1419_v1  ;;  %v1354_v7 = vld [vmem:[%s1807_s1 + $0x50] sm:$0xff]   ;;  %vm273_vm2 = vcmask 359424  }
   0x2   :  { %v1349_v2 = vld [vmem:[%s1807_s1] sm:$0xff]   ;;  %998 = vmatprep.subr.bf16.mxu0 %v1348_v0  ;;  %v1352_v5 = vld [vmem:[%s1807_s1 + $0x8] sm:$0xff]   ;;  %v1355_v8 = vld [vmem:[%s1807_s1 + $0x10] sm:$0xff]   ;;  %v1421_v22 = vmov 1966171168   ;;  %v1524_v24 = vshrl.u32 %v98_v13, 7 }
   0x3   :  { %v1350_v3 = vld [vmem:[%s1807_s1 + $0x80] sm:$0xff]   ;;  %999 = vmatpush3.bf16.msra.mxu0 %v1349_v2  ;;  %v1353_v6 = vld [vmem:[%s1807_s1 + $0x88] sm:$0xff]   ;;  %v1356_v9 = vld [vmem:[%s1807_s1 + $0x90] sm:$0x3f]   ;;  %v96_v23 = vunpack.c.l.s4 %v1421_v22 }
   0x4   :  { %1114 = vmatpush3.bf16.msra.mxu1 %v1350_v3  ;;  %1000 = vmatprep.subr.bf16.mxu0 %v1351_v4  ;;  %v1357_v10 = vld [vmem:[%s1807_s1 + $0x58] sm:$0xff]   ;;  %v279_v11 = vsel %vm277_vm1, %v1356_v9, 0  ;;  %v30_v14 = vld [vmem:[%s1806_s0] sm:$0x7]  ;;  %v31_v15 = vld [vmem:[%s1806_s0 + $0x3] sm:$0x7] }
   0x5   :  { %1115 = vmatprep.subr.bf16.mxu1 %v1419_v1  ;;  %v1358_v12 = vld [vmem:[%s1807_s1 + $0x18] sm:$0xff]   ;;  %v32_v16 = vld [vmem:[%s1806_s0 + $0x6] sm:$0x7]  ;;  %v33_v17 = vld [vmem:[%s1806_s0 + $0x9] sm:$0x7]  ;;  %v91_v25 = vcombine.low %v30_v14, %v31_v15  ;;  %v97_v30 = vunpack.c.0.s8 %v96_v23 }
   0x6   :  { %v34_v18 = vld [vmem:[%s1806_s0 + $0xc] sm:$0x7]  ;;  %v35_v19 = vld [vmem:[%s1806_s0 + $0xf] sm:$0x7]  ;;  %v36_v20 = vld [vmem:[%s1806_s0 + $0x12] sm:$0x7]  ;;  %v92_v27 = vcombine.low %v32_v16, %v33_v17 }
   0x7   :  { %1001 = vmatpush3.bf16.msra.mxu0 %v1352_v5  ;;  %v37_v21 = vld [vmem:[%s1806_s0 + $0x15] sm:$0x7]  ;;  %v1360_v26 = vld [vmem:[%s1807_s1 + $0x60] sm:$0xff]   ;;  %v93_v28 = vcombine.low %v34_v18, %v35_v19  ;;  %v100_v32 = vsub.s32 %v97_v30, %v1524_v24  ;;  %v1363_v33 = vld [vmem:[%s1807_s1 + $0x68] sm:$0xff]  }
   0x8   :  { %1116 = vmatpush3.bf16.msra.mxu1 %v1353_v6  ;;  %1002 = vmatprep.subr.bf16.mxu0 %v1354_v7  ;;  %v94_v29 = vcombine.low %v36_v20, %v37_v21  ;;  %v1361_v31 = vld [vmem:[%s1807_s1 + $0x20] sm:$0xff]   ;;  %v1364_v34 = vld [vmem:[%s1807_s1 + $0x28] sm:$0xff]   ;;  %v1366_v39 = vld [vmem:[%s1807_s1 + $0x70] sm:$0xff]  }
   0x9   :  { %1117 = vmatprep.subr.bf16.mxu1 %v1419_v1  ;;  %v101_v35 = vrot.slane %v91_v25, %v100_v32  ;;  %v108_v36 = vrot.slane %v92_v27, %v100_v32  ;;  %v115_v37 = vrot.slane %v93_v28, %v100_v32  ;;  %v1367_v44 = vld [vmem:[%s1807_s1 + $0x30] sm:$0xff]   ;;  %v1369_v47 = vld [vmem:[%s1807_s1 + $0x78] sm:$0xff]   ;;  %v1551_v50 = vld [vmem:[%s1808_s2] sm:$0xff]  }
   0xa   :  { %v122_v38 = vrot.slane %v94_v29, %v100_v32  ;;  %v1370_v53 = vld [vmem:[%s1807_s1 + $0x38] sm:$0xff]   ;;  %v1560_v54 = vld [vmem:[%s1808_s2 + $0x8] sm:$0xff]  }
   0xb   :  { %1003 = vmatpush3.bf16.msra.mxu0 %v1355_v8  ;;  %v123_v40 = vcombine.low %v101_v35, %v108_v36  ;;  %v124_v42 = vcombine.high %v101_v35, %v108_v36 }
   0xc   :  { %1118 = vmatpush3.bf16.msra.mxu1 %v279_v11  ;;  %1004 = vmatprep.subr.bf16.mxu0 %v1357_v10  ;;  %v125_v41 = vcombine.low %v115_v37, %v122_v38  ;;  %v126_v43 = vcombine.high %v115_v37, %v122_v38 }
   0xd   :  { %1123 = vmatprep.subr.bf16.mxu1 %v1419_v1  ;;  %v133_v45 = vrot.slane %v123_v40, %v100_v32  ;;  %v140_v48 = vrot.slane %v124_v42, %v100_v32 }
   0xe   :  { %v147_v46 = vrot.slane %v125_v41, %v100_v32  ;;  %v154_v49 = vrot.slane %v126_v43, %v100_v32 }
   0xf   :  { %1005 = vmatpush3.bf16.msra.mxu0 %v1358_v12 }
  0x10   :  { %1006 = vmatprep.subr.bf16.mxu0 %v1360_v26  ;;  %v156_v51 = vcombine.high %v133_v45, %v147_v46  ;;  %v157_v52 = vcombine.low %v140_v48, %v154_v49  ;;  %v155_v55 = vcombine.low %v133_v45, %v147_v46 }
  0x12   :  { %1120 = vmatmul.mubr.msk.bf16.vlgmr.msra.gmra.mrb[0].mxu1 %vm273_vm2, %v156_v51  ;;  %313 = vmatprep.mubr.bf16.mxu0 %v157_v52 }
  0x13   :  { %1007 = vmatpush3.bf16.msra.mxu0 %v1361_v31  ;;  %1124 = vmatpush3.bf16.msra.mxu1 %v1551_v50 }
  0x14   :  { %1008 = vmatprep.subr.bf16.mxu0 %v1363_v33  ;;  %1125 = vmatprep.subr.bf16.mxu1 %v1419_v1 }
  0x15   :  { %1139 = vmatprep.mubr.msk.bf16.mxu1 %vm1420_vm0, %v1419_v1 }
  0x17   :  { %1009 = vmatpush3.bf16.msra.mxu0 %v1364_v34 }
  0x18   :  { %1010 = vmatprep.subr.bf16.mxu0 %v1366_v39 }
  0x1b   :  { %1011 = vmatpush3.bf16.msra.mxu0 %v1367_v44 }
  0x1c   :  { %1012 = vmatprep.subr.bf16.mxu0 %v1369_v47 }
  0x1d   :  { %11 = vsyncpa [#allocation5], 0  ;;  %1126 = vmatpush3.bf16.msra.mxu1 %v1560_v54  ;;  %v1570_v56 = vld [vmem:[%s1808_s2 + $0x10] sm:$0xff]   ;;  %v1581_v57 = vld [vmem:[%s1808_s2 + $0x18] sm:$0xff]   ;;  %v1422_v4 = vmov 1983009808  }
  0x1e   :  { %1127 = vmatprep.subr.bf16.mxu1 %v1419_v1  ;;  %v1590_v58 = vld [vmem:[%s1808_s2 + $0x20] sm:$0xff]   ;;  %v1599_v59 = vld [vmem:[%s1808_s2 + $0x28] sm:$0xff]   ;;  %v1608_v60 = vld [vmem:[%s1808_s2 + $0x30] sm:$0xff]   ;;  %v367_v5 = vunpack.c.l.s4 %v1422_v4  ;;  %vm937_vm3 = vcmask 25600  }
  0x1f   :  { %1013 = vmatpush3.bf16.msra.mxu0 %v1370_v53  ;;  %v1617_v61 = vld [vmem:[%s1808_s2 + $0x38] sm:$0xff]   ;;  %v431_v62 = vld [vmem:[#allocation2] sm:$0x3] }
  0x20   :  { %1143 = vmatprep.subr.bf16.mxu0 %v1419_v1  ;;  %v433_v63 = vpack.c.bf16 %v431_v62, %v431_v62  ;;  %v368_v8 = vunpack.c.0.s8 %v367_v5  ;;  %v964_v9 = vld [vmem:[%s1809_s3] ss:$0 sm:$0xff] }
  0x21   :  { %1128 = vmatpush3.bf16.msra.mxu1 %v1570_v56 }
  0x22   :  { %314 = vmatmul.mubr.bf16.vlgmr.msra.gmra.mrb[0].mxu0 %v155_v55  ;;  %1129 = vmatprep.subr.bf16.mxu1 %v1419_v1  ;;  %v371_v15 = vsub.s32 %v368_v8, %v1524_v24 }
  0x23   :  { %1144 = vmatpush3.bf16.msra.mxu0 %v1551_v50  ;;  %1159 = vmatprep.mubr.msk.bf16.mxu0 %vm1420_vm0, %v1419_v1 }
  0x24   :  { %1145 = vmatprep.subr.bf16.mxu0 %v1419_v1 }
  0x25   :  { %1130 = vmatpush3.bf16.msra.mxu1 %v1581_v57 }
  0x26   :  { %1131 = vmatprep.subr.bf16.mxu1 %v1419_v1 }
  0x27   :  { %1146 = vmatpush3.bf16.msra.mxu0 %v1560_v54 }
  0x28   :  { %1147 = vmatprep.subr.bf16.mxu0 %v1419_v1 }
  0x29   :  { %1132 = vmatpush3.bf16.msra.mxu1 %v1590_v58 }
  0x2a   :  { %1133 = vmatprep.subr.bf16.mxu1 %v1419_v1 }
  0x2b   :  { %1148 = vmatpush3.bf16.msra.mxu0 %v1570_v56 }
  0x2c   :  { %1149 = vmatprep.subr.bf16.mxu0 %v1419_v1 }
  0x2d   :  { %1134 = vmatpush3.bf16.msra.mxu1 %v1599_v59 }
  0x2e   :  { %1135 = vmatprep.subr.bf16.mxu1 %v1419_v1 }
  0x2f   :  { %1150 = vmatpush3.bf16.msra.mxu0 %v1581_v57 }
  0x30   :  { %1151 = vmatprep.subr.bf16.mxu0 %v1419_v1 }
  0x31   :  { %1136 = vmatpush3.bf16.msra.mxu1 %v1608_v60 }
  0x32   :  { %1137 = vmatprep.subr.bf16.mxu1 %v1419_v1 }
  0x33   :  { %1152 = vmatpush3.bf16.msra.mxu0 %v1590_v58 }
  0x34   :  { %1153 = vmatprep.subr.bf16.mxu0 %v1419_v1 }
  0x35   :  { %1138 = vmatpush3.bf16.msra.mxu1 %v1617_v61 }
  0x36   :  { %1163 = vmatprep.subr.bf16.mxu1 %v1419_v1 }
  0x37   :  { %1154 = vmatpush3.bf16.msra.mxu0 %v1599_v59 }
  0x38   :  { %1155 = vmatprep.subr.bf16.mxu0 %v1419_v1  ;;  %1140 = vmatmul.mubr.bf16.vlgmr.msra.gmra.mrb[4].mxu1 %v433_v63 }
  0x39   :  { %1164 = vmatpush3.bf16.msra.mxu1 %v1551_v50  ;;  %1179 = vmatprep.mubr.msk.bf16.mxu1 %vm1420_vm0, %v1419_v1 }
  0x3a   :  { %1165 = vmatprep.subr.bf16.mxu1 %v1419_v1 }
  0x3b   :  { %1156 = vmatpush3.bf16.msra.mxu0 %v1608_v60 }
  0x3c   :  { %1157 = vmatprep.subr.bf16.mxu0 %v1419_v1 }
  0x3d   :  { %1166 = vmatpush3.bf16.msra.mxu1 %v1560_v54 }
  0x3e   :  { %1167 = vmatprep.subr.bf16.mxu1 %v1419_v1 }
  0x3f   :  { %1158 = vmatpush3.bf16.msra.mxu0 %v1617_v61 }
  0x40   :  { %1183 = vmatprep.subr.bf16.mxu0 %v1419_v1 }
  0x41   :  { %1168 = vmatpush3.bf16.msra.mxu1 %v1570_v56 }
  0x42   :  { %1169 = vmatprep.subr.bf16.mxu1 %v1419_v1 }
  0x45   :  { %1170 = vmatpush3.bf16.msra.mxu1 %v1581_v57 }
  0x46   :  { %1171 = vmatprep.subr.bf16.mxu1 %v1419_v1 }
  0x49   :  { %1172 = vmatpush3.bf16.msra.mxu1 %v1590_v58 }
  0x4a   :  { %1173 = vmatprep.subr.bf16.mxu1 %v1419_v1 }
  0x4d   :  { %1174 = vmatpush3.bf16.msra.mxu1 %v1599_v59 }
  0x4e   :  { %1175 = vmatprep.subr.bf16.mxu1 %v1419_v1 }
  0x51   :  { %1176 = vmatpush3.bf16.msra.mxu1 %v1608_v60 }
  0x52   :  { %1177 = vmatprep.subr.bf16.mxu1 %v1419_v1 }
  0x55   :  { %1178 = vmatpush3.bf16.msra.mxu1 %v1617_v61 }
  0x56   :  { %1203 = vmatprep.subr.bf16.mxu1 %v1419_v1 }
  0xe5   :  { %v356_v0 = vpop.f32.mrb[0].mxu1 }
  0xe6   :  { %v1121_v2 = vpop.f32.mrb[1].mxu1 }
  0xe7   :  { %v359_v3 = vpop.f32.mrb[2].mxu1 }
  0xe8   :  { %v1122_v6 = vpop.f32.mrb[3].mxu1 }
  0xf5   :  { %v1014_v7 = vpop.f32.mrb[0].mxu0 }
  0xf6   :  { %v1015_v10 = vpop.f32.mrb[1].mxu0 }
  0xf7   :  { %v1016_v11 = vadd.f32 %v1015_v10, %v1014_v7  ;;  %v1017_v12 = vpop.f32.mrb[2].mxu0 }
  0xf8   :  { %v1018_v13 = vpop.f32.mrb[3].mxu0 }
  0xf9   :  { %v316_v14 = vadd.f32 %v1016_v11, %v964_v9  ;;  %v1019_v16 = vadd.f32 %v1018_v13, %v1017_v12 }
  0xfb   :  { %v357_v17 = vadd.f32 %v356_v0, %v316_v14  ;;  %v319_v18 = vadd.f32 %v1019_v16, %v964_v9 }
  0xfd   :  { %v365_v19 = vcombine.high %v357_v17, %v357_v17  ;;  %v372_v20 = vrot.slane %v357_v17, %v371_v15  ;;  %985 = vst.sshfl [vmem:[#allocation3] sm:$0x3 pattern:$0x76325410] %v357_v17  ;;  %v360_v21 = vadd.f32 %v359_v3, %v319_v18  ;;  %v1423_v18 = vmov 0.0|0.0  }
  0xff   :  { %v379_v22 = vrot.slane %v365_v19, %v371_v15  ;;  %v380_v23 = vcombine.high %v372_v20, %v372_v20  ;;  %986 = vst.sshfl [vmem:[#allocation3 + $0x4] sm:$0x3 pattern:$0x76325410] %v365_v19  ;;  %v382_v25 = vcombine.high %v360_v21, %v360_v21  ;;  %v389_v26 = vrot.slane %v360_v21, %v371_v15  ;;  %v847_v20 = vld [vmem:[%s1810_s4 + $0x18] sm:$0xff] }
 0x100   :  { %987 = vst.sshfl [vmem:[#allocation3 + $0x8] sm:$0x3 pattern:$0x76325410] %v360_v21  ;;  %v848_v21 = vld [vmem:[%s1810_s4 + $0x20] sm:$0xff] }
 0x101   :  { %v381_v27 = vcombine.high %v379_v22, %v379_v22  ;;  %408 = vst [vmem:[#allocation3 + $0x2] sm:$0x3] %v380_v23  ;;  %v396_v28 = vrot.slane %v382_v25, %v371_v15  ;;  %v397_v29 = vcombine.high %v389_v26, %v389_v26  ;;  %988 = vst.sshfl [vmem:[#allocation3 + $0xc] sm:$0x3 pattern:$0x76325410] %v382_v25 }
 0x102   :  { %v849_v22 = vld [vmem:[%s1810_s4 + $0x28] sm:$0xff] }
 0x103   :  { %410 = vst [vmem:[#allocation3 + $0x6] sm:$0x3] %v381_v27  ;;  %v398_v24 = vcombine.high %v396_v28, %v396_v28  ;;  %412 = vst [vmem:[#allocation3 + $0xa] sm:$0x3] %v397_v29  ;;  %v1325_v23 = vpack.c.bf16 %v849_v22, %v848_v21 }
 0x104   :  { %v432_v30 = vld [vmem:[#allocation3] sm:$0x3] }
 0x105   :  { %414 = vst [vmem:[#allocation3 + $0xe] sm:$0x3] %v398_v24 }
 0x106   :  { %v570_v46 = vld [vmem:[#allocation3 + $0x4] sm:$0x3] }
 0x107   :  { %v660_v7 = vld [vmem:[#allocation3 + $0x8] sm:$0x3] }
 0x108   :  { %v525_v38 = vld [vmem:[#allocation3 + $0x2] sm:$0x3]  ;;  %v750_v25 = vld [vmem:[#allocation3 + $0xc] sm:$0x3] }
 0x10a   :  { %v615_v62 = vld [vmem:[#allocation3 + $0x6] sm:$0x3] }
 0x10b   :  { %v516_v31 = vpop.f32.mrb[4].mxu1 }
 0x10c   :  { %v522_v32 = vadd.f32 %v516_v31, %v432_v30  ;;  %v1141_v33 = vpop.f32.mrb[5].mxu1 }
 0x10d   :  { %v519_v34 = vpop.f32.mrb[6].mxu1  ;;  %v851_v33 = vld [vmem:[%s1810_s4 + $0x38] sm:$0xff] }
 0x10e   :  { %1375 = vtanh.f32 %v522_v32  ;;  %v1142_v35 = vpop.f32.mrb[7].mxu1  ;;  %v850_v32 = vld [vmem:[%s1810_s4 + $0x30] sm:$0xff] }
 0x10f   :  { %v1328_v34 = vpack.c.bf16 %v851_v33, %v850_v32  ;;  %v852_v35 = vld [vmem:[%s1810_s4 + $0x40] sm:$0xff] }
 0x118   :  { %v1376_v36 = vpop.eup %1375 }
 0x119   :  { %v526_v37 = vpack.c.bf16 %v1376_v36, %v1376_v36  ;;  %v853_v36 = vld [vmem:[%s1810_s4 + $0x48] sm:$0xff] }
 0x11b   :  { %1160 = vmatmul.mubr.bf16.vlgmr.msra.gmra.mrb[4].mxu0 %v526_v37  ;;  %v1331_v37 = vpack.c.bf16 %v853_v36, %v852_v35 }
 0x11c   :  { %1184 = vmatpush3.bf16.msra.mxu0 %v1551_v50  ;;  %1199 = vmatprep.mubr.msk.bf16.mxu0 %vm1420_vm0, %v1419_v1 }
 0x11d   :  { %1185 = vmatprep.subr.bf16.mxu0 %v1419_v1 }
 0x120   :  { %1186 = vmatpush3.bf16.msra.mxu0 %v1560_v54 }
 0x121   :  { %1187 = vmatprep.subr.bf16.mxu0 %v1419_v1 }
 0x124   :  { %1188 = vmatpush3.bf16.msra.mxu0 %v1570_v56 }
 0x125   :  { %1189 = vmatprep.subr.bf16.mxu0 %v1419_v1 }
 0x128   :  { %1190 = vmatpush3.bf16.msra.mxu0 %v1581_v57 }
 0x129   :  { %1191 = vmatprep.subr.bf16.mxu0 %v1419_v1 }
 0x12c   :  { %1192 = vmatpush3.bf16.msra.mxu0 %v1590_v58 }
 0x12d   :  { %1193 = vmatprep.subr.bf16.mxu0 %v1419_v1 }
 0x130   :  { %1194 = vmatpush3.bf16.msra.mxu0 %v1599_v59 }
 0x131   :  { %1195 = vmatprep.subr.bf16.mxu0 %v1419_v1 }
 0x134   :  { %1196 = vmatpush3.bf16.msra.mxu0 %v1608_v60 }
 0x135   :  { %1197 = vmatprep.subr.bf16.mxu0 %v1419_v1 }
 0x138   :  { %1198 = vmatpush3.bf16.msra.mxu0 %v1617_v61 }
 0x139   :  { %1223 = vmatprep.subr.bf16.mxu0 %v1419_v1 }
 0x1ee   :  { %v561_v39 = vpop.f32.mrb[4].mxu0 }
 0x1ef   :  { %v567_v40 = vadd.f32 %v561_v39, %v525_v38  ;;  %v1161_v41 = vpop.f32.mrb[5].mxu0  ;;  %v854_v38 = vld [vmem:[%s1810_s4 + $0x50] sm:$0xff]  ;;  %v855_v39 = vld [vmem:[%s1810_s4 + $0x58] sm:$0xff] }
 0x1f0   :  { %v564_v42 = vpop.f32.mrb[6].mxu0  ;;  %v856_v41 = vld [vmem:[%s1810_s4 + $0x60] sm:$0xff] }
 0x1f1   :  { %1377 = vtanh.f32 %v567_v40  ;;  %v1162_v43 = vpop.f32.mrb[7].mxu0  ;;  %v1334_v40 = vpack.c.bf16 %v855_v39, %v854_v38  ;;  %v857_v42 = vld [vmem:[%s1810_s4 + $0x68] sm:$0xff] }
 0x1f2   :  { %v1337_v43 = vpack.c.bf16 %v857_v42, %v856_v41 }
 0x1fb   :  { %v1378_v44 = vpop.eup %1377 }
 0x1fc   :  { %v571_v45 = vpack.c.bf16 %v1378_v44, %v1378_v44  ;;  %v858_v44 = vld [vmem:[%s1810_s4 + $0x70] sm:$0xff] }
 0x1fe   :  { %1180 = vmatmul.mubr.bf16.vlgmr.msra.gmra.mrb[8].mxu1 %v571_v45  ;;  %v859_v45 = vld [vmem:[%s1810_s4 + $0x78] sm:$0xff] }
 0x1ff   :  { %1204 = vmatpush3.bf16.msra.mxu1 %v1551_v50  ;;  %1219 = vmatprep.mubr.msk.bf16.mxu1 %vm1420_vm0, %v1419_v1 }
 0x200   :  { %1205 = vmatprep.subr.bf16.mxu1 %v1419_v1 }
 0x203   :  { %1206 = vmatpush3.bf16.msra.mxu1 %v1560_v54 }
 0x204   :  { %1207 = vmatprep.subr.bf16.mxu1 %v1419_v1 }
 0x207   :  { %1208 = vmatpush3.bf16.msra.mxu1 %v1570_v56 }
 0x208   :  { %1209 = vmatprep.subr.bf16.mxu1 %v1419_v1 }
 0x20b   :  { %1210 = vmatpush3.bf16.msra.mxu1 %v1581_v57 }
 0x20c   :  { %1211 = vmatprep.subr.bf16.mxu1 %v1419_v1 }
 0x20f   :  { %1212 = vmatpush3.bf16.msra.mxu1 %v1590_v58 }
 0x210   :  { %1213 = vmatprep.subr.bf16.mxu1 %v1419_v1 }
 0x213   :  { %1214 = vmatpush3.bf16.msra.mxu1 %v1599_v59 }
 0x214   :  { %1215 = vmatprep.subr.bf16.mxu1 %v1419_v1 }
 0x217   :  { %1216 = vmatpush3.bf16.msra.mxu1 %v1608_v60 }
 0x218   :  { %1217 = vmatprep.subr.bf16.mxu1 %v1419_v1 }
 0x21b   :  { %1218 = vmatpush3.bf16.msra.mxu1 %v1617_v61 }
 0x21c   :  { %1243 = vmatprep.subr.bf16.mxu1 %v1419_v1 }
 0x2d1   :  { %v606_v47 = vpop.f32.mrb[8].mxu1 }
 0x2d2   :  { %v612_v48 = vadd.f32 %v606_v47, %v570_v46  ;;  %v1181_v49 = vpop.f32.mrb[9].mxu1  ;;  %v1340_v46 = vpack.c.bf16 %v859_v45, %v858_v44  ;;  %v795_v47 = vld [vmem:[#allocation3 + $0xe] sm:$0x3] }
 0x2d3   :  { %v609_v51 = vpop.f32.mrb[10].mxu1 }
 0x2d4   :  { %1379 = vtanh.f32 %v612_v48  ;;  %v1182_v52 = vpop.f32.mrb[11].mxu1 }
 0x2de   :  { %v1380_v53 = vpop.eup %1379 }
 0x2df   :  { %v616_v55 = vpack.c.bf16 %v1380_v53, %v1380_v53 }
 0x2e1   :  { %1200 = vmatmul.mubr.bf16.vlgmr.msra.gmra.mrb[8].mxu0 %v616_v55 }
 0x2e2   :  { %1224 = vmatpush3.bf16.msra.mxu0 %v1551_v50  ;;  %1239 = vmatprep.mubr.msk.bf16.mxu0 %vm1420_vm0, %v1419_v1 }
 0x2e3   :  { %1225 = vmatprep.subr.bf16.mxu0 %v1419_v1 }
 0x2e6   :  { %1226 = vmatpush3.bf16.msra.mxu0 %v1560_v54 }
 0x2e7   :  { %1227 = vmatprep.subr.bf16.mxu0 %v1419_v1 }
 0x2ea   :  { %1228 = vmatpush3.bf16.msra.mxu0 %v1570_v56 }
 0x2eb   :  { %1229 = vmatprep.subr.bf16.mxu0 %v1419_v1 }
 0x2ee   :  { %1230 = vmatpush3.bf16.msra.mxu0 %v1581_v57 }
 0x2ef   :  { %1231 = vmatprep.subr.bf16.mxu0 %v1419_v1 }
 0x2f2   :  { %1232 = vmatpush3.bf16.msra.mxu0 %v1590_v58 }
 0x2f3   :  { %1233 = vmatprep.subr.bf16.mxu0 %v1419_v1 }
 0x2f6   :  { %1234 = vmatpush3.bf16.msra.mxu0 %v1599_v59 }
 0x2f7   :  { %1235 = vmatprep.subr.bf16.mxu0 %v1419_v1 }
 0x2fa   :  { %1236 = vmatpush3.bf16.msra.mxu0 %v1608_v60 }
 0x2fb   :  { %1237 = vmatprep.subr.bf16.mxu0 %v1419_v1 }
 0x2fe   :  { %1238 = vmatpush3.bf16.msra.mxu0 %v1617_v61 }
 0x2ff   :  { %1263 = vmatprep.subr.bf16.mxu0 %v1419_v1 }
 0x3b4   :  { %v651_v63 = vpop.f32.mrb[8].mxu0 }
 0x3b5   :  { %v657_v0 = vadd.f32 %v651_v63, %v615_v62  ;;  %v1201_v2 = vpop.f32.mrb[9].mxu0  ;;  %v997_v63 = vld [vmem:[%s1811_s5] ss:$0 sm:$0xff] }
 0x3b6   :  { %v654_v3 = vpop.f32.mrb[10].mxu0 }
 0x3b7   :  { %1381 = vtanh.f32 %v657_v0  ;;  %v1202_v4 = vpop.f32.mrb[11].mxu0 }
 0x3c1   :  { %v1382_v5 = vpop.eup %1381 }
 0x3c2   :  { %v661_v6 = vpack.c.bf16 %v1382_v5, %v1382_v5 }
 0x3c4   :  { %1220 = vmatmul.mubr.bf16.vlgmr.msra.gmra.mrb[12].mxu1 %v661_v6 }
 0x3c5   :  { %1244 = vmatpush3.bf16.msra.mxu1 %v1551_v50  ;;  %1259 = vmatprep.mubr.msk.bf16.mxu1 %vm1420_vm0, %v1419_v1 }
 0x3c6   :  { %1245 = vmatprep.subr.bf16.mxu1 %v1419_v1 }
 0x3c9   :  { %1246 = vmatpush3.bf16.msra.mxu1 %v1560_v54 }
 0x3ca   :  { %1247 = vmatprep.subr.bf16.mxu1 %v1419_v1 }
 0x3cd   :  { %1248 = vmatpush3.bf16.msra.mxu1 %v1570_v56 }
 0x3ce   :  { %1249 = vmatprep.subr.bf16.mxu1 %v1419_v1 }
 0x3d1   :  { %1250 = vmatpush3.bf16.msra.mxu1 %v1581_v57 }
 0x3d2   :  { %1251 = vmatprep.subr.bf16.mxu1 %v1419_v1 }
 0x3d5   :  { %1252 = vmatpush3.bf16.msra.mxu1 %v1590_v58 }
 0x3d6   :  { %1253 = vmatprep.subr.bf16.mxu1 %v1419_v1 }
 0x3d9   :  { %1254 = vmatpush3.bf16.msra.mxu1 %v1599_v59 }
 0x3da   :  { %1255 = vmatprep.subr.bf16.mxu1 %v1419_v1 }
 0x3dd   :  { %1256 = vmatpush3.bf16.msra.mxu1 %v1608_v60 }
 0x3de   :  { %1257 = vmatprep.subr.bf16.mxu1 %v1419_v1 }
 0x3e1   :  { %1258 = vmatpush3.bf16.msra.mxu1 %v1617_v61 }
 0x3e2   :  { %1318 = vmatprep.subr.bf16.mxu1 %v1423_v18 }
 0x497   :  { %v696_v8 = vpop.f32.mrb[12].mxu1 }
 0x498   :  { %v702_v9 = vadd.f32 %v696_v8, %v660_v7  ;;  %v1221_v10 = vpop.f32.mrb[13].mxu1 }
 0x499   :  { %v699_v11 = vpop.f32.mrb[14].mxu1 }
 0x49a   :  { %1383 = vtanh.f32 %v702_v9  ;;  %v1222_v12 = vpop.f32.mrb[15].mxu1 }
 0x4a4   :  { %v1384_v13 = vpop.eup %1383 }
 0x4a5   :  { %v706_v14 = vpack.c.bf16 %v1384_v13, %v1384_v13 }
 0x4a7   :  { %1240 = vmatmul.mubr.bf16.vlgmr.msra.gmra.mrb[12].mxu0 %v706_v14 }
 0x4a8   :  { %1264 = vmatpush3.bf16.msra.mxu0 %v1551_v50  ;;  %1279 = vmatprep.mubr.msk.bf16.mxu0 %vm1420_vm0, %v1419_v1  ;;  %v705_v50 = vld [vmem:[#allocation3 + $0xa] sm:$0x3] }
 0x4a9   :  { %1265 = vmatprep.subr.bf16.mxu0 %v1419_v1 }
 0x4ac   :  { %1266 = vmatpush3.bf16.msra.mxu0 %v1560_v54 }
 0x4ad   :  { %1267 = vmatprep.subr.bf16.mxu0 %v1419_v1 }
 0x4b0   :  { %1268 = vmatpush3.bf16.msra.mxu0 %v1570_v56 }
 0x4b1   :  { %1269 = vmatprep.subr.bf16.mxu0 %v1419_v1 }
 0x4b4   :  { %1270 = vmatpush3.bf16.msra.mxu0 %v1581_v57 }
 0x4b5   :  { %1271 = vmatprep.subr.bf16.mxu0 %v1419_v1 }
 0x4b8   :  { %1272 = vmatpush3.bf16.msra.mxu0 %v1590_v58 }
 0x4b9   :  { %1273 = vmatprep.subr.bf16.mxu0 %v1419_v1 }
 0x4bc   :  { %1274 = vmatpush3.bf16.msra.mxu0 %v1599_v59  ;;  %v844_v59 = vld [vmem:[%s1810_s4] sm:$0xff] }
 0x4bd   :  { %1275 = vmatprep.subr.bf16.mxu0 %v1419_v1 }
 0x4c0   :  { %1276 = vmatpush3.bf16.msra.mxu0 %v1608_v60  ;;  %v845_v60 = vld [vmem:[%s1810_s4 + $0x8] sm:$0xff] }
 0x4c1   :  { %1277 = vmatprep.subr.bf16.mxu0 %v1419_v1  ;;  %v1319_v19 = vpack.c.bf16 %v845_v60, %v844_v59 }
 0x4c4   :  { %1278 = vmatpush3.bf16.msra.mxu0 %v1617_v61  ;;  %v846_v61 = vld [vmem:[%s1810_s4 + $0x10] sm:$0xff]  ;;  %s1424_s4 = smov [#allocation4]  }
 0x4c5   :  { %s956_s22 = sshll.u32 %s1424_s4, 4  ;;  %s957_s22 = int_to_ptr.vmem [resolvable:$true] %s956_s22 }
 0x4c6   :  { %s1395_s5 = scalar_lea.vmem %s957_s22, 32  ;;  %p1400_p1 = scmp.lt.s32.totalorder %s957_s22, %s957_s22 }
 0x4c7   :  { %p1396_p0 = scmp.ne.s32.totalorder %s957_s22, %s1395_s5  ;;  %p1401_p2 = scmp.lt.s32.totalorder %s1395_s5, %s1395_s5 }
 0x4c9   :  { %p1402_p3 = por %p1401_p2, %p1400_p1 }
 0x4cb   :  { %p1403_p4 = pnand %p1402_p3, %p1396_p0 }
 0x57a   :  { %v741_v54 = vpop.f32.mrb[12].mxu0 }
 0x57b   :  { %v747_v56 = vadd.f32 %v741_v54, %v705_v50  ;;  %v1241_v57 = vpop.f32.mrb[13].mxu0 }
 0x57c   :  { %v744_v15 = vpop.f32.mrb[14].mxu0 }
 0x57d   :  { %1385 = vtanh.f32 %v747_v56  ;;  %v1242_v16 = vpop.f32.mrb[15].mxu0 }
 0x587   :  { %v1386_v58 = vpop.eup %1385 }
 0x588   :  { %v751_v17 = vpack.c.bf16 %v1386_v58, %v1386_v58 }
 0x58a   :  { %1260 = vmatmul.mubr.bf16.vlgmr.msra.gmra.mrb[16].mxu1 %v751_v17 }
 0x58b   :  { %1315 = vmatprep.mubr.msk.f32.mxu1 %vm1420_vm0, %v1419_v1  ;;  %1320 = vmatpush3.bf16.msra.mxu1 %v1319_v19  ;;  %v1322_v1 = vpack.c.bf16 %v847_v20, %v846_v61 }
 0x58c   :  { %1321 = vmatprep.subr.bf16.mxu1 %v1423_v18 }
 0x58f   :  { %1323 = vmatpush3.bf16.msra.mxu1 %v1322_v1 }
 0x590   :  { %1324 = vmatprep.subr.bf16.mxu1 %v1423_v18 }
 0x593   :  { %1326 = vmatpush3.bf16.msra.mxu1 %v1325_v23 }
 0x594   :  { %1327 = vmatprep.subr.bf16.mxu1 %v1423_v18 }
 0x597   :  { %1329 = vmatpush3.bf16.msra.mxu1 %v1328_v34 }
 0x598   :  { %1330 = vmatprep.subr.bf16.mxu1 %v1423_v18 }
 0x59b   :  { %1332 = vmatpush3.bf16.msra.mxu1 %v1331_v37 }
 0x59c   :  { %1333 = vmatprep.subr.bf16.mxu1 %v1423_v18 }
 0x59f   :  { %1335 = vmatpush3.bf16.msra.mxu1 %v1334_v40 }
 0x5a0   :  { %1336 = vmatprep.subr.bf16.mxu1 %v1423_v18 }
 0x5a3   :  { %1338 = vmatpush3.bf16.msra.mxu1 %v1337_v43 }
 0x5a4   :  { %1339 = vmatprep.subr.bf16.mxu1 %v1423_v18 }
 0x5a7   :  { %1341 = vmatpush3.bf16.msra.mxu1 %v1340_v46 }
 0x65d   :  { %v786_v26 = vpop.f32.mrb[16].mxu1 }
 0x65e   :  { %v792_v27 = vadd.f32 %v786_v26, %v750_v25  ;;  %v1261_v28 = vpop.f32.mrb[17].mxu1 }
 0x65f   :  { %v789_v29 = vpop.f32.mrb[18].mxu1 }
 0x660   :  { %1387 = vtanh.f32 %v792_v27  ;;  %v1262_v24 = vpop.f32.mrb[19].mxu1 }
 0x66a   :  { %v1388_v30 = vpop.eup %1387 }
 0x66b   :  { %v796_v31 = vpack.c.bf16 %v1388_v30, %v1388_v30 }
 0x66d   :  { %1280 = vmatmul.mubr.bf16.vlgmr.msra.gmra.mrb[16].mxu0 %v796_v31 }
 0x740   :  { %v831_v48 = vpop.f32.mrb[16].mxu0 }
 0x741   :  { %v837_v49 = vadd.f32 %v831_v48, %v795_v47  ;;  %v1281_v51 = vpop.f32.mrb[17].mxu0 }
 0x742   :  { %v834_v52 = vpop.f32.mrb[18].mxu0 }
 0x743   :  { %1389 = vtanh.f32 %v837_v49  ;;  %v1282_v53 = vpop.f32.mrb[19].mxu0 }
 0x74d   :  { %v1390_v55 = vpop.eup %1389 }
 0x74e   :  { %839 = vst [vmem:[#allocation2] sm:$0x3] %v1390_v55 }
 0x755   :  { %v843_v62 = vld [vmem:[#allocation2] sm:$0x3] }
 0x756   :  { %1316 = vmatmul.mubr.f32.vlgmr.msra.gmra.mrb[20].mxu1 %v843_v62 }
 0x829   :  { %v933_v0 = vpop.f32.mrb[20].mxu1 }
 0x82a   :  { %v934_v2 = vadd.f32 %v997_v63, %v933_v0  ;;  %v1317_v3 = vpop.f32.mrb[21].mxu1 }
 0x82c   :  { %v938_v4 = vsel %vm937_vm3, %v934_v2, -inf }
 0x82d   :  { %939 = vmax.xlane.f32.xlu0 %v938_v4 }
 0x8ba   :  { %v940_v5 = vpop.xlane.xlu0 %939 }
 0x8bb   :  { %v941_v6 = vsub.f32 %v934_v2, %v940_v5 }
 0x8bd   :  { %v942_v7 = vmul.f32 1.442695, %v941_v6 }
 0x8bf   :  { %1391 = vpow2.f32 %v942_v7 }
 0x8c9   :  { %v1392_v8 = vpop.eup %1391 }
 0x8ca   :  { %v944_v9 = vsel %vm937_vm3, %v1392_v8, 0.0 }
 0x8cb   :  { %945 = vadd.xlane.f32.xlu0 %v944_v9 }
 0x958   :  { %v946_v10 = vpop.xlane.xlu0 %945 }
 0x959   :  { %1393 = vrcp.f32 %v946_v10 }
 0x963   :  { %v1394_v11 = vpop.eup %1393 }
 0x964   :  { %v948_v12 = vmul.f32 %v1394_v11, %v1392_v8 }
 0x966   :  { %949 = vst.msk [vmem:[#allocation4] sm:$0x3] %vm937_vm3, %v948_v12 }
 0x967   :  { %1406 = shalt.err (!%p1403_p4)
}
 0x968   :  { %s1407_s25 = scalar_lea.hbm %s1812_s6, 32 }
 0x969   :  { %p1408_p5 = scmp.ne.s32.totalorder %s1812_s6, %s1407_s25  ;;  %p1411_p6 = scmp.lt.u32.totalorder %s1407_s25, %s1812_s6 }
 0x96b   :  { %p1413_p7 = pnand %p1411_p6, %p1408_p5 }
 0x96d   :  { %1416 = shalt.err (!%p1413_p7)
}
 0x96e   :  { %959 = dma.vmem_to_hbm [thread:$0]  %s957_s22, 32, %s1812_s6, [#allocation5]  }
 0x96f   :  { %1417 = dma.done.wait [#allocation5], 32  }
 0x970   :  { %1418 = vsyncadd [#allocation5], 4294967264 }
 0x971   :  { %963 = vsyncpa [#allocation5], 1 }

</bundles_post_ra>
